<compile_context>
chip_gen: v5e
topology: v5e:2x2
jax: 0.10.0
libtpu: 0.0.40
codegen_flags: <defaults>
</compile_context>

<pallas_src>
import numpy as np
import jax
import jax.numpy as jnp
from jax.experimental import pallas as pl
from jax.experimental.pallas import tpu as pltpu


# ----------------------------------------------------------------------------
# Constant sinusoidal table — identical math to the PyTorch __init__.
# ----------------------------------------------------------------------------
def make_positional_encoding(d_model: int, max_len: int = 512) -> jnp.ndarray:
    position = np.arange(0, max_len, dtype=np.float32)[:, None]               # (max_len, 1)
    div_term = np.exp(np.arange(0, d_model, 2, dtype=np.float32)
                      * (-np.log(10000.0) / d_model))                         # (ceil(d/2),)
    pe = np.zeros((max_len, d_model), dtype=np.float32)
    pe[:, 0::2] = np.sin(position * div_term)
    pe[:, 1::2] = np.cos(position * div_term[: d_model // 2])
    return jnp.asarray(pe)[None, :, :]                                        # (1, max_len, d_model)


# ----------------------------------------------------------------------------
# Kernel: elementwise broadcast-add of the pe tile onto the x tile.
# pe's leading block dim is 1, so the + broadcasts over any batch-blocked
# leading dim of the x tile.
# ----------------------------------------------------------------------------
def _add_pe_kernel(x_ref, pe_ref, o_ref):
    o_ref[...] = (x_ref[...] + pe_ref[...]).astype(o_ref.dtype)


# Row budget per tile in the lane-dense (..., 128) layout:
#   8192 rows * 128 lanes * 4 B = 4 MiB per f32 tile.
# x + pe + out, each double-buffered -> ~24 MiB, under the explicit 48 MiB
# vmem_limit below on every generation (v5e/v6e 128 MiB physical, v7x 64 MiB).
_MAX_TILE_ROWS = 8192
_VMEM_LIMIT_BYTES = 48 << 20


def _compiler_params(n_grid_dims: int) -> pltpu.CompilerParams:
    return pltpu.CompilerParams(
        dimension_semantics=("parallel",) * n_grid_dims,   # no reduction axis anywhere
        vmem_limit_bytes=_VMEM_LIMIT_BYTES,
    )


def positional_encoding_forward(x: jnp.ndarray, pe: jnp.ndarray) -> jnp.ndarray:
    """y = x + pe[:, :S, :].   x: (B, S, D);  pe: (1, max_len, D)."""
    B, S, D = x.shape
    if S > pe.shape[1]:
        raise ValueError(f"sequence length {S} exceeds positional-encoding max_len {pe.shape[1]}")
    pe_slice = pe[:, :S, :].astype(x.dtype)     # static slice + dtype match (plain JAX glue)

    N = S * D
    itemsize = jnp.dtype(x.dtype).itemsize
    cost = pl.CostEstimate(
        flops=B * N,
        transcendentals=0,
        bytes_accessed=(2 * B * N + N) * itemsize,
    )

    if N % 128 == 0:
        # ---- Lane-dense fast path: flatten (S, D) -> (n_rows, 128) ----
        n_rows = N // 128
        x2 = x.reshape(B, n_rows, 128)
        pe2 = pe_slice.reshape(1, n_rows, 128)

        if n_rows <= _MAX_TILE_ROWS:
            # Whole per-batch slab fits one tile: block over batch too, so one pe
            # fetch is amortised over b_blk batches and the grid-step count (fixed
            # ~0.35 us each) drops.  Block stays fully contiguous in HBM.
            b_blk = max(1, min(B, _MAX_TILE_ROWS // max(n_rows, 1)))
            grid = (pl.cdiv(B, b_blk),)
            in_specs = [
                pl.BlockSpec((b_blk, n_rows, 128), lambda b: (b, 0, 0)),   # x
                pl.BlockSpec((1, n_rows, 128), lambda b: (0, 0, 0)),       # pe (broadcast)
            ]
            out_spec = pl.BlockSpec((b_blk, n_rows, 128), lambda b: (b, 0, 0))
        else:
            # cdiv row tiling: fixed multiple-of-8 tile, Pallas masks the ragged
            # last tile.  Batch innermost so pe's block index is invariant along
            # it and the pe tile is DMA'd once per row tile.
            t_rows = _MAX_TILE_ROWS
            grid = (pl.cdiv(n_rows, t_rows), B)
            in_specs = [
                pl.BlockSpec((1, t_rows, 128), lambda n, b: (b, n, 0)),    # x
                pl.BlockSpec((1, t_rows, 128), lambda n, b: (0, n, 0)),    # pe: invariant in b
            ]
            out_spec = pl.BlockSpec((1, t_rows, 128), lambda n, b: (b, n, 0))

        out2 = pl.pallas_call(
            _add_pe_kernel,
            out_shape=jax.ShapeDtypeStruct((B, n_rows, 128), x.dtype),
            grid_spec=pltpu.PrefetchScalarGridSpec(
                num_scalar_prefetch=0,
                grid=grid,
                in_specs=in_specs,
                out_specs=out_spec,
            ),
            compiler_params=_compiler_params(len(grid)),
            input_output_aliases={0: 0},        # in-place over x (caller donates x)
            cost_estimate=cost,
        )(x2, pe2)
        return out2.reshape(B, S, D)

    # ---- Fallback: S*D not a multiple of 128.  Tile the S axis to bound VMEM;
    # stores are masked on the lane axis only because D % 128 != 0 (unavoidable
    # without padding). ----
    t_s = S if S <= 1024 else 1024              # full extent, or multiple of 8 (cdiv masks)
    grid = (B, pl.cdiv(S, t_s))
    return pl.pallas_call(
        _add_pe_kernel,
        out_shape=jax.ShapeDtypeStruct((B, S, D), x.dtype),
        grid_spec=pltpu.PrefetchScalarGridSpec(
            num_scalar_prefetch=0,
            grid=grid,
            in_specs=[
                pl.BlockSpec((1, t_s, D), lambda b, s: (b, s, 0)),         # x
                pl.BlockSpec((1, t_s, D), lambda b, s: (0, s, 0)),         # pe
            ],
            out_specs=pl.BlockSpec((1, t_s, D), lambda b, s: (b, s, 0)),
        ),
        compiler_params=_compiler_params(len(grid)),
        input_output_aliases={0: 0},
        cost_estimate=cost,
    )(x, pe_slice)


if __name__ == "__main__":
    B, S, D = 2, 8, 32
    MAX_LEN = 512

    key = jax.random.PRNGKey(0)
    x = jax.random.normal(key, (B, S, D), dtype=jnp.float32)
    pe = make_positional_encoding(D, MAX_LEN)

    # Reference (plain-JAX semantics of the PyTorch forward) computed BEFORE the
    # donated call, so x's buffer may safely be consumed by the kernel.
    ref = np.asarray(x + pe[:, :S, :])

    # Donate x so input_output_aliases={0: 0} takes effect without a defensive copy.
    fwd = jax.jit(positional_encoding_forward, donate_argnums=(0,))
    out = jax.block_until_ready(fwd(x, pe))

    np.testing.assert_allclose(np.asarray(out), ref, rtol=1e-6, atol=1e-6)
    print("KERNEL_OK")
</pallas_src>

<mosaic_0001>
module attributes {stable_mosaic.version = 11 : i64} {
  func.func @_add_pe_kernel(%arg0: i32, %arg1: memref<2x2x128xf32, #tpu.memory_space<vmem>>, %arg2: memref<1x2x128xf32, #tpu.memory_space<vmem>>, %arg3: memref<2x2x128xf32, #tpu.memory_space<vmem>>) attributes {dimension_semantics = [#tpu.dimension_semantics<parallel>], iteration_bounds = array<i64: 1>, scalar_prefetch = 0 : i64, scratch_operands = 0 : i64, tpu.core_type = #tpu.core_type<tc>, window_params = [{transform_indices = @transform_0, window_bounds = array<i64: 2, 2, 128>}, {pipeline_mode = #tpu.pipeline_mode<synchronous>, transform_indices = @transform_1, window_bounds = array<i64: 1, 2, 128>}, {transform_indices = @transform_2, window_bounds = array<i64: 2, 2, 128>}]} {
    %c0 = arith.constant 0 : index
    %c0_0 = arith.constant 0 : index
    %c0_1 = arith.constant 0 : index
    %0 = vector.load %arg1[%c0, %c0_0, %c0_1] : memref<2x2x128xf32, #tpu.memory_space<vmem>>, vector<2x2x128xf32>
    %c0_2 = arith.constant 0 : index
    %c0_3 = arith.constant 0 : index
    %c0_4 = arith.constant 0 : index
    %1 = vector.load %arg2[%c0_2, %c0_3, %c0_4] : memref<1x2x128xf32, #tpu.memory_space<vmem>>, vector<1x2x128xf32>
    %2 = vector.broadcast %1 : vector<1x2x128xf32> to vector<2x2x128xf32>
    %3 = arith.addf %0, %2 : vector<2x2x128xf32>
    %c0_5 = arith.constant 0 : index
    %c0_6 = arith.constant 0 : index
    %c0_7 = arith.constant 0 : index
    %4 = vector.load %arg3[%c0_5, %c0_6, %c0_7] : memref<2x2x128xf32, #tpu.memory_space<vmem>>, vector<2x2x128xf32>
    tpu.vector_store %arg3[%c0_5, %c0_6, %c0_7], %3 {strides = array<i32>} : memref<2x2x128xf32, #tpu.memory_space<vmem>>, vector<2x2x128xf32>,
    return
  }
  func.func @transform_0(%arg0: i32) -> (i32, i32, i32) {
    %c0_i32 = arith.constant 0 : i32
    %c0_i32_0 = arith.constant 0 : i32
    %c0_i32_1 = arith.constant 0 : i32
    return %arg0, %c0_i32, %c0_i32_0 : i32, i32, i32
  }
  func.func @transform_1(%arg0: i32) -> (i32, i32, i32) {
    %c0_i32 = arith.constant 0 : i32
    %c0_i32_0 = arith.constant 0 : i32
    %c0_i32_1 = arith.constant 0 : i32
    %c0_i32_2 = arith.constant 0 : i32
    return %c0_i32, %c0_i32_0, %c0_i32_1 : i32, i32, i32
  }
  func.func @transform_2(%arg0: i32) -> (i32, i32, i32) {
    %c0_i32 = arith.constant 0 : i32
    %c0_i32_0 = arith.constant 0 : i32
    %c0_i32_1 = arith.constant 0 : i32
    return %arg0, %c0_i32, %c0_i32_0 : i32, i32, i32
  }
}

</mosaic_0001>

<bundles_post_ra>
// kernel: positional_encoding_forward.1
= control target key start
LH: loop header
LB: loop body
LE: loop exit
PB: predicated region body
PF: predicated region fallthrough
CT: control target
= control target key end

     0   :  { %s52_s0 = inlined_call_operand.vmem [shape: f32[2,2,128], index: 0, kind: input, shape index: {}, may-alias: {0,2}]   ;;  %s53_s1 = inlined_call_operand.vmem [shape: f32[1,2,128], index: 1, kind: input, shape index: {}]   ;;  %s54_s2 = inlined_call_operand.vmem [shape: f32[2,2,128], index: 2, kind: output, shape index: {}, may-alias: {0,2}]  }
   0x1   :  { %v11_v0 = vld [vmem:[%s52_s0] sm:$0x3]  ;;  %v12_v2 = vld [vmem:[%s52_s0 + $0x2] sm:$0x3] }
   0x2   :  { %v13_v1 = vld [vmem:[%s53_s1] sm:$0x3] }
   0x3   :  { %v14_v3 = vadd.f32 %v13_v1, %v11_v0  ;;  %v15_v4 = vadd.f32 %v13_v1, %v12_v2 }
   0x5   :  { %16 = vst [vmem:[%s54_s2] sm:$0x3] %v14_v3 }
   0x6   :  { %17 = vst [vmem:[%s54_s2 + $0x2] sm:$0x3] %v15_v4 }

</bundles_post_ra>
